<compile_context>
chip_gen: v5e
topology: v5e:2x2
jax: 0.10.0
libtpu: 0.0.40
codegen_flags: <defaults>
</compile_context>

<pallas_src>
import functools

import jax
import jax.numpy as jnp
from jax.experimental import pallas as pl
from jax.experimental.pallas import tpu as pltpu


def _grad_kernel(x_ref, w1_ref, b1T_ref, w2_ref, b2T_ref, w2wT_ref, w1s_ref,
                 out_ref):
    # Shapes (TB = batch tile):
    #   x    : (TB, D)       w1  : (H1, D)     b1T : (H1, 1)
    #   w2   : (H2, H1)      b2T : (H2, 1)
    #   w2wT : (H1, H2)   (= (w3 * W2)^T, w3 folded in)
    #   w1s  : (H1, D-1)  (= W1[:, :D-1], fuses grad[:, :-1])
    #   out  : (TB, D-1)
    x = x_ref[...]                                                    # (TB, D) f32

    # ---- forward, batch on lanes:  h = W @ x^T ----
    h1 = jnp.einsum("hd,bd->hb", w1_ref[...], x,
                    preferred_element_type=jnp.float32) + b1T_ref[...]
    a1 = jnp.tanh(h1)                                                 # (H1, TB)
    h2 = jnp.dot(w2_ref[...], a1,
                 preferred_element_type=jnp.float32) + b2T_ref[...]
    a2 = jnp.tanh(h2)                                                 # (H2, TB)

    # ---- manual backward of sum(y) wrt x ----
    d2 = 1.0 - a2 * a2                                                # (H2, TB)
    g1 = (jnp.dot(w2wT_ref[...], d2, preferred_element_type=jnp.float32)
          * (1.0 - a1 * a1))                                          # (H1, TB)
    # final matmul contracts the H1 axes -> row-major (TB, D-1) output block,
    # with the trailing-column drop already fused via the column-sliced W1.
    grad = jnp.einsum("hb,hd->bd", g1, w1s_ref[...],
                      preferred_element_type=jnp.float32)             # (TB, D-1)
    out_ref[...] = grad.astype(out_ref.dtype)


def _round_up(v, m):
    return (v + m - 1) // m * m


def _choose_tile_b(batch, tile_b_max):
    """Lane-width-multiple batch tile; >=2 grid steps for moderate batches."""
    b128 = _round_up(max(batch, 1), 128)
    if b128 > tile_b_max:
        return tile_b_max
    if b128 >= 256:
        # Split into >= 2 grid steps so the "parallel" batch axis can feed
        # both TensorCores on v7x (2 TC/chip); single tile for tiny batches.
        return _round_up(pl.cdiv(b128, 2), 128)
    return b128


@functools.partial(jax.jit, static_argnames=("tile_b_max", "out_dtype"))
def grad_model(x, w1, b1, w2, b2, w3, *, tile_b_max=4096, out_dtype=None):
    """Returns d/dx[sum(action(x))] with the last input column dropped: (B, D-1)."""
    B, D = x.shape
    H1 = w1.shape[0]
    H2 = w2.shape[0]
    out_dtype = x.dtype if out_dtype is None else out_dtype

    tile_b = _choose_tile_b(B, tile_b_max)
    num_tiles = pl.cdiv(B, tile_b)
    B_pad = num_tiles * tile_b

    # Pad the batch only when necessary (trace-time decision): padded rows go
    # through bounded math (tanh) and are sliced off at the end, so they can
    # never contaminate valid rows (no cross-batch contractions anywhere).
    x_in = x.astype(jnp.float32)
    if B_pad != B:
        x_in = jnp.pad(x_in, ((0, B_pad - B), (0, 0)))

    # Weight prep (tiny tensors; negligible traffic).
    f32 = jnp.float32
    w1_c = w1.astype(f32)                                   # (H1, D)
    w2_c = w2.astype(f32)                                   # (H2, H1)
    b1T = b1.reshape(-1, 1).astype(f32)                     # (H1, 1)
    b2T = b2.reshape(-1, 1).astype(f32)                     # (H2, 1)
    w2wT = (w3.reshape(-1, 1).astype(f32) * w2_c).T         # (H1, H2)  w3 folded
    w1s = w1_c[:, :D - 1]                                   # (H1, D-1) fused [:, :-1]

    out_itemsize = jnp.dtype(out_dtype).itemsize
    flops = 2 * B_pad * (H1 * D + 2 * H1 * H2 + H1 * (D - 1))
    bytes_accessed = (B_pad * D * 4                                  # x in
                      + B_pad * (D - 1) * out_itemsize               # grad out
                      + 4 * (H1 * D + 2 * H1 * H2 + H1 * (D - 1)     # weights
                             + H1 + H2))                             # biases

    grad = pl.pallas_call(
        _grad_kernel,
        out_shape=jax.ShapeDtypeStruct((B_pad, D - 1), out_dtype),
        grid=(num_tiles,),
        in_specs=[
            pl.BlockSpec((tile_b, D), lambda i: (i, 0)),      # x tile (row-major)
            pl.BlockSpec((H1, D), lambda i: (0, 0)),          # W1
            pl.BlockSpec((H1, 1), lambda i: (0, 0)),          # b1^T
            pl.BlockSpec((H2, H1), lambda i: (0, 0)),         # W2
            pl.BlockSpec((H2, 1), lambda i: (0, 0)),          # b2^T
            pl.BlockSpec((H1, H2), lambda i: (0, 0)),         # (w3*W2)^T
            pl.BlockSpec((H1, D - 1), lambda i: (0, 0)),      # W1[:, :D-1]
        ],
        out_specs=pl.BlockSpec((tile_b, D - 1), lambda i: (i, 0)),
        compiler_params=pltpu.CompilerParams(
            dimension_semantics=("parallel",),
            vmem_limit_bytes=32 * 1024 * 1024),   # raise v5e's 16 MiB scoped default
        cost_estimate=pl.CostEstimate(
            flops=flops,
            transcendentals=B_pad * (H1 + H2),
            bytes_accessed=bytes_accessed),
    )(x_in, w1_c, b1T, w2_c, b2T, w2wT, w1s)

    return grad[:B] if B_pad != B else grad


def _action_ref(x, w1, b1, w2, b2, w3, b3):
    """Plain-JAX reference of the `action` MLP (for correctness check)."""
    a1 = jnp.tanh(x @ w1.T + b1)
    a2 = jnp.tanh(a1 @ w2.T + b2)
    return a2 @ w3.T + b3


if __name__ == "__main__":
    D, H = 8, 32  # input dim (7 state dims + 1 time), hidden width

    key = jax.random.PRNGKey(0)
    k = jax.random.split(key, 8)
    w1 = jax.random.normal(k[1], (H, D), dtype=jnp.float32) * 0.2
    b1 = jax.random.normal(k[2], (1, H), dtype=jnp.float32) * 0.1
    w2 = jax.random.normal(k[3], (H, H), dtype=jnp.float32) * 0.2
    b2 = jax.random.normal(k[4], (1, H), dtype=jnp.float32) * 0.1
    w3 = jax.random.normal(k[5], (1, H), dtype=jnp.float32) * 0.2
    b3 = jax.random.normal(k[6], (1, 1), dtype=jnp.float32) * 0.1

    # Exercise both the single-tile path (B=16) and the padded 2-tile path (B=200).
    for B in (16, 200):
        x = jax.random.normal(jax.random.fold_in(k[0], B), (B, D), dtype=jnp.float32)
        # autodiff reference of the original module's forward (f32)
        ref = jax.grad(
            lambda xx: jnp.sum(_action_ref(xx, w1, b1, w2, b2, w3, b3)))(x)[:, :-1]

        out = grad_model(x, w1, b1, w2, b2, w3)
        jax.block_until_ready(out)
        assert out.shape == (B, D - 1), out.shape
        err = jnp.max(jnp.abs(out - ref))
        assert jnp.allclose(out, ref, atol=1e-4, rtol=1e-4), f"B={B} max err {err}"

    print("KERNEL_OK")
</pallas_src>

<mosaic_0001>
module attributes {stable_mosaic.version = 11 : i64} {
  func.func @_grad_kernel(%arg0: i32, %arg1: memref<128x8xf32, #tpu.memory_space<vmem>>, %arg2: memref<32x8xf32, #tpu.memory_space<vmem>>, %arg3: memref<32x1xf32, #tpu.memory_space<vmem>>, %arg4: memref<32x32xf32, #tpu.memory_space<vmem>>, %arg5: memref<32x1xf32, #tpu.memory_space<vmem>>, %arg6: memref<32x32xf32, #tpu.memory_space<vmem>>, %arg7: memref<32x7xf32, #tpu.memory_space<vmem>>, %arg8: memref<128x7xf32, #tpu.memory_space<vmem>>) attributes {dimension_semantics = [#tpu.dimension_semantics<parallel>], iteration_bounds = array<i64: 1>, scalar_prefetch = 0 : i64, scratch_operands = 0 : i64, tpu.core_type = #tpu.core_type<tc>, window_params = [{transform_indices = @transform_0, window_bounds = array<i64: 128, 8>}, {pipeline_mode = #tpu.pipeline_mode<synchronous>, transform_indices = @transform_1, window_bounds = array<i64: 32, 8>}, {pipeline_mode = #tpu.pipeline_mode<synchronous>, transform_indices = @transform_2, window_bounds = array<i64: 32, 1>}, {pipeline_mode = #tpu.pipeline_mode<synchronous>, transform_indices = @transform_3, window_bounds = array<i64: 32, 32>}, {pipeline_mode = #tpu.pipeline_mode<synchronous>, transform_indices = @transform_4, window_bounds = array<i64: 32, 1>}, {pipeline_mode = #tpu.pipeline_mode<synchronous>, transform_indices = @transform_5, window_bounds = array<i64: 32, 32>}, {pipeline_mode = #tpu.pipeline_mode<synchronous>, transform_indices = @transform_6, window_bounds = array<i64: 32, 7>}, {transform_indices = @transform_7, window_bounds = array<i64: 128, 7>}]} {
    %c0 = arith.constant 0 : index
    %c0_0 = arith.constant 0 : index
    %0 = vector.load %arg1[%c0, %c0_0] : memref<128x8xf32, #tpu.memory_space<vmem>>, vector<128x8xf32>
    %c0_1 = arith.constant 0 : index
    %c0_2 = arith.constant 0 : index
    %1 = vector.load %arg2[%c0_1, %c0_2] : memref<32x8xf32, #tpu.memory_space<vmem>>, vector<32x8xf32>
    "tpu.trace_start"() <{level = 10 : i32, message = "hd,bd->hb"}> : () -> ()
    %cst = arith.constant dense<0.000000e+00> : vector<32x128xf32>
    %2 = tpu.matmul %1, %0, %cst {dimension_numbers = #tpu.dot_dimension_numbers<[1], [1], [0], [0], [0, 0, 1, 0], [], []>} : vector<32x8xf32>, vector<128x8xf32>, vector<32x128xf32> -> vector<32x128xf32>
    "tpu.trace_stop"() : () -> ()
    %c0_3 = arith.constant 0 : index
    %c0_4 = arith.constant 0 : index
    %3 = vector.load %arg3[%c0_3, %c0_4] : memref<32x1xf32, #tpu.memory_space<vmem>>, vector<32x1xf32>
    %4 = vector.broadcast %3 : vector<32x1xf32> to vector<32x128xf32>
    %5 = arith.addf %2, %4 : vector<32x128xf32>
    %6 = math.tanh %5 : vector<32x128xf32>
    %c0_5 = arith.constant 0 : index
    %c0_6 = arith.constant 0 : index
    %7 = vector.load %arg4[%c0_5, %c0_6] : memref<32x32xf32, #tpu.memory_space<vmem>>, vector<32x32xf32>
    %cst_7 = arith.constant dense<0.000000e+00> : vector<32x128xf32>
    %8 = tpu.matmul %7, %6, %cst_7 {dimension_numbers = #tpu.dot_dimension_numbers<[1], [0], [0], [1], [0, 0, 1, 1], [], []>} : vector<32x32xf32>, vector<32x128xf32>, vector<32x128xf32> -> vector<32x128xf32>
    %c0_8 = arith.constant 0 : index
    %c0_9 = arith.constant 0 : index
    %9 = vector.load %arg5[%c0_8, %c0_9] : memref<32x1xf32, #tpu.memory_space<vmem>>, vector<32x1xf32>
    %10 = vector.broadcast %9 : vector<32x1xf32> to vector<32x128xf32>
    %11 = arith.addf %8, %10 : vector<32x128xf32>
    %12 = math.tanh %11 : vector<32x128xf32>
    %13 = arith.mulf %12, %12 : vector<32x128xf32>
    %cst_10 = arith.constant 1.000000e+00 : f32
    %14 = vector.broadcast %cst_10 : f32 to vector<32x128xf32>
    %15 = arith.subf %14, %13 : vector<32x128xf32>
    %c0_11 = arith.constant 0 : index
    %c0_12 = arith.constant 0 : index
    %16 = vector.load %arg6[%c0_11, %c0_12] : memref<32x32xf32, #tpu.memory_space<vmem>>, vector<32x32xf32>
    %cst_13 = arith.constant dense<0.000000e+00> : vector<32x128xf32>
    %17 = tpu.matmul %16, %15, %cst_13 {dimension_numbers = #tpu.dot_dimension_numbers<[1], [0], [0], [1], [0, 0, 1, 1], [], []>} : vector<32x32xf32>, vector<32x128xf32>, vector<32x128xf32> -> vector<32x128xf32>
    %18 = arith.mulf %6, %6 : vector<32x128xf32>
    %cst_14 = arith.constant 1.000000e+00 : f32
    %19 = vector.broadcast %cst_14 : f32 to vector<32x128xf32>
    %20 = arith.subf %19, %18 : vector<32x128xf32>
    %21 = arith.mulf %17, %20 : vector<32x128xf32>
    %c0_15 = arith.constant 0 : index
    %c0_16 = arith.constant 0 : index
    %22 = vector.load %arg7[%c0_15, %c0_16] : memref<32x7xf32, #tpu.memory_space<vmem>>, vector<32x7xf32>
    "tpu.trace_start"() <{level = 10 : i32, message = "hb,hd->bd"}> : () -> ()
    %cst_17 = arith.constant dense<0.000000e+00> : vector<128x7xf32>
    %23 = tpu.matmul %21, %22, %cst_17 {dimension_numbers = #tpu.dot_dimension_numbers<[0], [0], [1], [1], [0, 1, 1, 1], [], []>} : vector<32x128xf32>, vector<32x7xf32>, vector<128x7xf32> -> vector<128x7xf32>
    "tpu.trace_stop"() : () -> ()
    %c0_18 = arith.constant 0 : index
    %c0_19 = arith.constant 0 : index
    %24 = vector.load %arg8[%c0_18, %c0_19] : memref<128x7xf32, #tpu.memory_space<vmem>>, vector<128x7xf32>
    tpu.vector_store %arg8[%c0_18, %c0_19], %23 {strides = array<i32>} : memref<128x7xf32, #tpu.memory_space<vmem>>, vector<128x7xf32>,
    return
  }
  func.func @transform_0(%arg0: i32) -> (i32, i32) {
    %c0_i32 = arith.constant 0 : i32
    %c0_i32_0 = arith.constant 0 : i32
    return %arg0, %c0_i32 : i32, i32
  }
  func.func @transform_1(%arg0: i32) -> (i32, i32) {
    %c0_i32 = arith.constant 0 : i32
    %c0_i32_0 = arith.constant 0 : i32
    %c0_i32_1 = arith.constant 0 : i32
    return %c0_i32, %c0_i32_0 : i32, i32
  }
  func.func @transform_2(%arg0: i32) -> (i32, i32) {
    %c0_i32 = arith.constant 0 : i32
    %c0_i32_0 = arith.constant 0 : i32
    %c0_i32_1 = arith.constant 0 : i32
    return %c0_i32, %c0_i32_0 : i32, i32
  }
  func.func @transform_3(%arg0: i32) -> (i32, i32) {
    %c0_i32 = arith.constant 0 : i32
    %c0_i32_0 = arith.constant 0 : i32
    %c0_i32_1 = arith.constant 0 : i32
    return %c0_i32, %c0_i32_0 : i32, i32
  }
  func.func @transform_4(%arg0: i32) -> (i32, i32) {
    %c0_i32 = arith.constant 0 : i32
    %c0_i32_0 = arith.constant 0 : i32
    %c0_i32_1 = arith.constant 0 : i32
    return %c0_i32, %c0_i32_0 : i32, i32
  }
  func.func @transform_5(%arg0: i32) -> (i32, i32) {
    %c0_i32 = arith.constant 0 : i32
    %c0_i32_0 = arith.constant 0 : i32
    %c0_i32_1 = arith.constant 0 : i32
    return %c0_i32, %c0_i32_0 : i32, i32
  }
  func.func @transform_6(%arg0: i32) -> (i32, i32) {
    %c0_i32 = arith.constant 0 : i32
    %c0_i32_0 = arith.constant 0 : i32
    %c0_i32_1 = arith.constant 0 : i32
    return %c0_i32, %c0_i32_0 : i32, i32
  }
  func.func @transform_7(%arg0: i32) -> (i32, i32) {
    %c0_i32 = arith.constant 0 : i32
    %c0_i32_0 = arith.constant 0 : i32
    return %arg0, %c0_i32 : i32, i32
  }
}

</mosaic_0001>

<bundles_post_ra>
// kernel: grad_model.1
= control target key start
LH: loop header
LB: loop body
LE: loop exit
PB: predicated region body
PF: predicated region fallthrough
CT: control target
= control target key end

     0   :  { %vm70_vm0 = vcmask 64512   ;;  %v542_v10 = vmov 0   ;;  %vm192_vm1 = vcmask 261120   ;;  %vm452_vm2 = vcmask 56320   ;;  %s826_s0 = inlined_call_operand.vmem [shape: f32[128,8], index: 0, kind: input, shape index: {}]   ;;  %s827_s2 = inlined_call_operand.vmem [shape: f32[32,1], index: 2, kind: input, shape index: {}]   ;;  %s828_s4 = inlined_call_operand.vmem [shape: f32[32,1], index: 4, kind: input, shape index: {}]   ;;  %s829_s1 = inlined_call_operand.vmem [shape: f32[32,8], index: 1, kind: input, shape index: {}, may-alias: {1,6}]   ;;  %s830_s3 = inlined_call_operand.vmem [shape: f32[32,32], index: 3, kind: input, shape index: {}]   ;;  %s831_s5 = inlined_call_operand.vmem [shape: f32[32,32], index: 5, kind: input, shape index: {}]   ;;  %s832_s6 = inlined_call_operand.vmem [shape: f32[32,7], index: 6, kind: input, shape index: {}, may-alias: {1,6}]   ;;  %s833_s7 = inlined_call_operand.vmem [shape: f32[128,7], index: 7, kind: output, shape index: {}]  }
   0x1   :  { %v41_v0 = vld [vmem:[%s826_s0 + $0x78] sm:$0xff]  ;;  %v40_v1 = vld [vmem:[%s826_s0 + $0x70] sm:$0xff]  ;;  %v39_v2 = vld [vmem:[%s826_s0 + $0x68] sm:$0xff]  ;;  %524 = vset.pattern.permute.xlu1 %v542_v10  ;;  %523 = vset.pattern.permute.xlu0 %v542_v10 }
   0x2   :  { %473 = vmatpush.xpose.msk.msra.mxu0 %vm70_vm0, %v41_v0  ;;  %v38_v3 = vld [vmem:[%s826_s0 + $0x60] sm:$0xff]  ;;  %v37_v4 = vld [vmem:[%s826_s0 + $0x58] sm:$0xff]  ;;  %v36_v5 = vld [vmem:[%s826_s0 + $0x50] sm:$0xff]  ;;  %525 = vset.pattern.permute.xlu2 %v542_v10 }
   0x3   :  { %v35_v6 = vld [vmem:[%s826_s0 + $0x48] sm:$0xff]  ;;  %v34_v7 = vld [vmem:[%s826_s0 + $0x40] sm:$0xff]  ;;  %v33_v8 = vld [vmem:[%s826_s0 + $0x38] sm:$0xff] }
   0x4   :  { %v47_v9 = vld [vmem:[%s827_s2 + $0x8] sm:$0xff]  ;;  %v32_v11 = vld [vmem:[%s826_s0 + $0x30] sm:$0xff]  ;;  %v46_v13 = vld [vmem:[%s827_s2] sm:$0xff] }
   0x5   :  { %57 = vperm.xlu1 %524, %v47_v9   ;;  %v31_v12 = vld [vmem:[%s826_s0 + $0x28] sm:$0xff]  ;;  %v49_v14 = vld [vmem:[%s827_s2 + $0x18] sm:$0xff]  ;;  %v30_v15 = vld [vmem:[%s826_s0 + $0x20] sm:$0xff] }
   0x6   :  { %474 = vmatpush.xpose.msk.msra.mxu0 %vm70_vm0, %v40_v1  ;;  %67 = vperm.xlu0 %523, %v49_v14   ;;  %v29_v16 = vld [vmem:[%s826_s0 + $0x18] sm:$0xff]  ;;  %v48_v17 = vld [vmem:[%s827_s2 + $0x10] sm:$0xff]  ;;  %v27_v19 = vld [vmem:[%s826_s0 + $0x8] sm:$0xff] }
   0x7   :  { %v28_v18 = vld [vmem:[%s826_s0 + $0x10] sm:$0xff]  ;;  %v169_v20 = vld [vmem:[%s828_s4 + $0x8] sm:$0xff]  ;;  %v168_v21 = vld [vmem:[%s828_s4] sm:$0xff] }
   0x8   :  { %v26_v22 = vld [vmem:[%s826_s0] sm:$0xff]  ;;  %v43_v24 = vld [vmem:[%s829_s1 + $0x8] sm:$0xff]  ;;  %v44_v25 = vld [vmem:[%s829_s1 + $0x10] sm:$0xff] }
   0x9   :  { %v42_v23 = vld [vmem:[%s829_s1] sm:$0xff]  ;;  %v45_v26 = vld [vmem:[%s829_s1 + $0x18] sm:$0xff]  ;;  %v170_v45 = vld [vmem:[%s828_s4 + $0x10] sm:$0xff] }
   0xa   :  { %475 = vmatpush.xpose.msk.msra.mxu0 %vm70_vm0, %v39_v2  ;;  %v171_v40 = vld [vmem:[%s828_s4 + $0x18] sm:$0xff]  ;;  %v164_v43 = vld [vmem:[%s830_s3] sm:$0xff]  ;;  %v165_v46 = vld [vmem:[%s830_s3 + $0x8] sm:$0xff] }
   0xb   :  { %189 = vperm.xlu2 %525, %v171_v40   ;;  %v166_v47 = vld [vmem:[%s830_s3 + $0x10] sm:$0xff]  ;;  %v167_v48 = vld [vmem:[%s830_s3 + $0x18] sm:$0xff]  ;;  %v246_v9 = vld [vmem:[%s831_s5] sm:$0xff] }
   0xc   :  { %v247_v10 = vld [vmem:[%s831_s5 + $0x8] sm:$0xff]  ;;  %v306_v14 = vld [vmem:[%s832_s6 + $0x18] sm:$0xff] }
   0xd   :  { %52 = vperm.xlu1 %524, %v46_v13   ;;  %517 = vmatpush.msra.mxu3 %v306_v14 }
   0xe   :  { %476 = vmatpush.xpose.msk.msra.mxu0 %vm70_vm0, %v38_v3  ;;  %62 = vperm.xlu0 %523, %v48_v17  }
  0x12   :  { %477 = vmatpush.xpose.msk.msra.mxu0 %vm70_vm0, %v37_v4 }
  0x13   :  { %184 = vperm.xlu2 %525, %v170_v45  }
  0x15   :  { %174 = vperm.xlu1 %524, %v168_v21  }
  0x16   :  { %478 = vmatpush.xpose.msk.msra.mxu0 %vm70_vm0, %v36_v5  ;;  %179 = vperm.xlu0 %523, %v169_v20  }
  0x1a   :  { %479 = vmatpush.xpose.msk.msra.mxu0 %vm70_vm0, %v35_v6 }
  0x1e   :  { %480 = vmatpush.xpose.msk.msra.mxu0 %vm70_vm0, %v34_v7 }
  0x22   :  { %481 = vmatpush.xpose.msk.msra.mxu0 %vm70_vm0, %v33_v8 }
  0x26   :  { %482 = vmatpush.xpose.msk.msra.mxu0 %vm70_vm0, %v32_v11  ;;  %v248_v11 = vld [vmem:[%s831_s5 + $0x10] sm:$0xff] }
  0x2a   :  { %483 = vmatpush.xpose.msk.msra.mxu0 %vm70_vm0, %v31_v12  ;;  %v249_v12 = vld [vmem:[%s831_s5 + $0x18] sm:$0xff] }
  0x2e   :  { %484 = vmatpush.xpose.msk.msra.mxu0 %vm70_vm0, %v30_v15  ;;  %v305_v15 = vld [vmem:[%s832_s6 + $0x10] sm:$0xff] }
  0x2f   :  { %518 = vmatpush.msra.mxu3 %v305_v15 }
  0x32   :  { %485 = vmatpush.xpose.msk.msra.mxu0 %vm70_vm0, %v29_v16  ;;  %v304_v16 = vld [vmem:[%s832_s6 + $0x8] sm:$0xff] }
  0x33   :  { %519 = vmatpush.msra.mxu3 %v304_v16 }
  0x36   :  { %486 = vmatpush.xpose.msk.msra.mxu0 %vm70_vm0, %v28_v18  ;;  %v303_v18 = vld [vmem:[%s832_s6] sm:$0xff] }
  0x37   :  { %520 = vmatpush.msra.mxu3 %v303_v18 }
  0x3a   :  { %487 = vmatpush.xpose.msk.msra.mxu0 %vm70_vm0, %v27_v19 }
  0x3e   :  { %488 = vmatpush.xpose.msk.msra.mxu0 %vm70_vm0, %v26_v22 }
  0x41   :  { %489 = vmatmul.msk.f32.vlgmr.msra.gmra.mxu0 %vm70_vm0, %v42_v23 }
  0x49   :  { %490 = vmatmul.msk.f32.gmra.mxu0 %vm70_vm0, %v43_v24 }
  0x51   :  { %491 = vmatmul.msk.f32.gmra.mxu0 %vm70_vm0, %v44_v25 }
  0x59   :  { %492 = vmatmul.msk.f32.gmra.mxu0 %vm70_vm0, %v45_v26 }
  0x65   :  { %v190_v50 = vpop.permute.xlu2 %189 }
  0x6d   :  { %v185_v53 = vpop.permute.xlu2 %184 }
  0x77   :  { %v58_v30 = vpop.permute.xlu1 %57 }
  0x78   :  { %v68_v29 = vpop.permute.xlu0 %67 }
  0x7f   :  { %v53_v36 = vpop.permute.xlu1 %52 }
  0x80   :  { %v63_v32 = vpop.permute.xlu0 %62 }
  0x87   :  { %v175_v57 = vpop.permute.xlu1 %174 }
  0x88   :  { %v180_v54 = vpop.permute.xlu0 %179 }
  0xbe   :  { %v148_v27 = vpop.f32.mrf.mxu0 }
  0xbf   :  { %v149_v38 = vadd.f32 %v148_v27, %v53_v36 }
  0xc6   :  { %v151_v28 = vpop.f32.mrf.mxu0 }
  0xc7   :  { %v152_v37 = vadd.f32 %v151_v28, %v58_v30 }
  0xce   :  { %v154_v31 = vpop.f32.mrf.mxu0 }
  0xcf   :  { %v155_v34 = vadd.f32 %v154_v31, %v63_v32 }
  0xd6   :  { %v157_v33 = vpop.f32.mrf.mxu0 }
  0xd7   :  { %v158_v35 = vadd.f32 %v157_v33, %v68_v29 }
  0xd9   :  { %526 = vtanh.f32 %v158_v35 }
  0xda   :  { %528 = vtanh.f32 %v155_v34 }
  0xdb   :  { %530 = vtanh.f32 %v152_v37 }
  0xdc   :  { %532 = vtanh.f32 %v149_v38 }
  0xdf   :  { %v681_v39 = vpop.eup %526 }
  0xe0   :  { %217 = vmatpush.msra.mxu1 %v681_v39  ;;  %v687_v41 = vpop.eup %528  ;;  %v294_v29 = vmul.f32 %v681_v39, %v681_v39 }
  0xe1   :  { %v690_v42 = vpop.eup %530  ;;  %v293_v25 = vmul.f32 %v687_v41, %v687_v41 }
  0xe2   :  { %218 = vmatpush.msra.mxu1 %v687_v41  ;;  %v533_v44 = vpop.eup %532  ;;  %v292_v21 = vmul.f32 %v690_v42, %v690_v42  ;;  %v298_v30 = vsub.f32 1.0, %v294_v29 }
  0xe3   :  { %v291_v13 = vmul.f32 %v533_v44, %v533_v44  ;;  %v297_v26 = vsub.f32 1.0, %v293_v25 }
  0xe4   :  { %219 = vmatpush.msra.mxu1 %v690_v42  ;;  %v296_v22 = vsub.f32 1.0, %v292_v21 }
  0xe5   :  { %v295_v17 = vsub.f32 1.0, %v291_v13 }
  0xe6   :  { %220 = vmatpush.msra.mxu1 %v533_v44 }
  0xe7   :  { %493 = vmatmul.msk.f32.vlgmr.msra.gmra.mxu1 %vm192_vm1, %v164_v43 }
  0xe8   :  { %399 = vmatpush.msrb.mxu1 %v306_v14 }
  0xea   :  { %400 = vmatpush.msrb.mxu1 %v305_v15 }
  0xec   :  { %401 = vmatpush.msrb.mxu1 %v304_v16 }
  0xee   :  { %402 = vmatpush.msrb.mxu1 %v303_v18 }
  0xef   :  { %494 = vmatmul.msk.f32.gmra.mxu1 %vm192_vm1, %v165_v46 }
  0xf7   :  { %495 = vmatmul.msk.f32.gmra.mxu1 %vm192_vm1, %v166_v47 }
  0xff   :  { %496 = vmatmul.msk.f32.gmra.mxu1 %vm192_vm1, %v167_v48 }
 0x164   :  { %v222_v49 = vpop.f32.mrf.mxu1 }
 0x165   :  { %v223_v59 = vadd.f32 %v222_v49, %v175_v57 }
 0x16c   :  { %v225_v51 = vpop.f32.mrf.mxu1 }
 0x16d   :  { %v226_v56 = vadd.f32 %v225_v51, %v180_v54 }
 0x174   :  { %v228_v52 = vpop.f32.mrf.mxu1 }
 0x175   :  { %v229_v55 = vadd.f32 %v228_v52, %v185_v53 }
 0x177   :  { %534 = vtanh.f32 %v229_v55 }
 0x178   :  { %536 = vtanh.f32 %v226_v56 }
 0x17c   :  { %v231_v58 = vpop.f32.mrf.mxu1 }
 0x17d   :  { %v232_v60 = vadd.f32 %v231_v58, %v190_v50  ;;  %v535_v61 = vpop.eup %534 }
 0x17e   :  { %v537_v62 = vpop.eup %536  ;;  %v240_v1 = vmul.f32 %v535_v61, %v535_v61 }
 0x17f   :  { %538 = vtanh.f32 %v232_v60  ;;  %v239_v4 = vmul.f32 %v537_v62, %v537_v62 }
 0x180   :  { %540 = vtanh.f32 %v223_v59  ;;  %v244_v5 = vsub.f32 1.0, %v240_v1 }
 0x181   :  { %v243_v7 = vsub.f32 1.0, %v239_v4 }
 0x185   :  { %v539_v63 = vpop.eup %538 }
 0x186   :  { %v241_v0 = vmul.f32 %v539_v63, %v539_v63  ;;  %v541_v2 = vpop.eup %540 }
 0x187   :  { %v238_v6 = vmul.f32 %v541_v2, %v541_v2 }
 0x188   :  { %v245_v3 = vsub.f32 1.0, %v241_v0 }
 0x189   :  { %v242_v8 = vsub.f32 1.0, %v238_v6 }
 0x18a   :  { %274 = vmatpush.msra.mxu2 %v245_v3 }
 0x18c   :  { %275 = vmatpush.msra.mxu2 %v244_v5 }
 0x18e   :  { %276 = vmatpush.msra.mxu2 %v243_v7 }
 0x190   :  { %277 = vmatpush.msra.mxu2 %v242_v8 }
 0x191   :  { %497 = vmatmul.msk.f32.vlgmr.msra.gmra.mxu2 %vm192_vm1, %v246_v9 }
 0x199   :  { %498 = vmatmul.msk.f32.gmra.mxu2 %vm192_vm1, %v247_v10 }
 0x1a1   :  { %499 = vmatmul.msk.f32.gmra.mxu2 %vm192_vm1, %v248_v11 }
 0x1a9   :  { %500 = vmatmul.msk.f32.gmra.mxu2 %vm192_vm1, %v249_v12 }
 0x214   :  { %v279_v19 = vpop.f32.mrf.mxu2 }
 0x215   :  { %v299_v20 = vmul.f32 %v295_v17, %v279_v19 }
 0x217   :  { %307 = vxpose.xlu2.b32.start [1/4] (short) %v299_v20, 128 }
 0x21c   :  { %v282_v23 = vpop.f32.mrf.mxu2 }
 0x21d   :  { %v300_v24 = vmul.f32 %v296_v22, %v282_v23 }
 0x21f   :  { %308 = vxpose.xlu2.b32.cont [2/4] (short) %v300_v24, 128 }
 0x224   :  { %v285_v27 = vpop.f32.mrf.mxu2 }
 0x225   :  { %v301_v28 = vmul.f32 %v297_v26, %v285_v27 }
 0x227   :  { %309 = vxpose.xlu2.b32.cont [3/4] (short) %v301_v28, 128 }
 0x22c   :  { %v288_v31 = vpop.f32.mrf.mxu2 }
 0x22d   :  { %v302_v32 = vmul.f32 %v298_v30, %v288_v31 }
 0x22f   :  { %310 = vxpose.xlu2.b32.end [4/4] (short) %v302_v32, 128 }
 0x2b0   :  { %v323_v33 = vpop.trf.xlu2 }
 0x2b1   :  { %501 = vmatmul.msk.f32.vlgmr.msrb.gmra.mxu1 %vm192_vm1, %v323_v33 }
 0x2b8   :  { %v324_v34 = vpop.trf.xlu2 }
 0x2b9   :  { %502 = vmatmul.msk.f32.gmra.mxu1 %vm192_vm1, %v324_v34 }
 0x2c0   :  { %v325_v35 = vpop.trf.xlu2 }
 0x2c1   :  { %503 = vmatmul.msk.f32.gmra.mxu1 %vm192_vm1, %v325_v35 }
 0x2c8   :  { %v326_v36 = vpop.trf.xlu2 }
 0x2c9   :  { %504 = vmatmul.msk.f32.gmra.mxu1 %vm192_vm1, %v326_v36 }
 0x2d0   :  { %v327_v37 = vpop.trf.xlu2 }
 0x2d1   :  { %505 = vmatmul.msk.f32.gmra.mxu1 %vm192_vm1, %v327_v37 }
 0x2d8   :  { %v328_v38 = vpop.trf.xlu2 }
 0x2d9   :  { %506 = vmatmul.msk.f32.gmra.mxu1 %vm192_vm1, %v328_v38 }
 0x2e0   :  { %v329_v39 = vpop.trf.xlu2 }
 0x2e1   :  { %507 = vmatmul.msk.f32.gmra.mxu1 %vm192_vm1, %v329_v39 }
 0x2e8   :  { %v330_v40 = vpop.trf.xlu2 }
 0x2e9   :  { %508 = vmatmul.msk.f32.vlgmr.msra.gmra.mxu3 %vm192_vm1, %v330_v40 }
 0x2f0   :  { %v331_v41 = vpop.trf.xlu2 }
 0x2f1   :  { %509 = vmatmul.msk.f32.gmra.mxu3 %vm192_vm1, %v331_v41 }
 0x2f8   :  { %v332_v42 = vpop.trf.xlu2 }
 0x2f9   :  { %510 = vmatmul.msk.f32.gmra.mxu3 %vm192_vm1, %v332_v42 }
 0x300   :  { %v333_v43 = vpop.trf.xlu2 }
 0x301   :  { %511 = vmatmul.msk.f32.gmra.mxu3 %vm192_vm1, %v333_v43 }
 0x308   :  { %v334_v44 = vpop.trf.xlu2 }
 0x309   :  { %512 = vmatmul.msk.f32.gmra.mxu3 %vm192_vm1, %v334_v44 }
 0x310   :  { %v335_v45 = vpop.trf.xlu2 }
 0x311   :  { %513 = vmatmul.msk.f32.gmra.mxu3 %vm192_vm1, %v335_v45 }
 0x318   :  { %v336_v46 = vpop.trf.xlu2 }
 0x319   :  { %514 = vmatmul.msk.f32.gmra.mxu3 %vm192_vm1, %v336_v46 }
 0x320   :  { %v337_v47 = vpop.trf.xlu2 }
 0x321   :  { %515 = vmatmul.msk.f32.gmra.mxu3 %vm192_vm1, %v337_v47 }
 0x328   :  { %v338_v48 = vpop.trf.xlu2 }
 0x329   :  { %516 = vmatmul.msk.f32.gmra.mxu3 %vm192_vm1, %v338_v48 }
 0x32e   :  { %v404_v49 = vpop.f32.mrf.mxu1 }
 0x32f   :  { %453 = vst.msk [vmem:[%s833_s7] sm:$0xff] %vm452_vm2, %v404_v49 }
 0x336   :  { %v407_v50 = vpop.f32.mrf.mxu1 }
 0x337   :  { %454 = vst.msk [vmem:[%s833_s7 + $0x8] sm:$0xff] %vm452_vm2, %v407_v50 }
 0x33e   :  { %v410_v51 = vpop.f32.mrf.mxu1 }
 0x33f   :  { %455 = vst.msk [vmem:[%s833_s7 + $0x10] sm:$0xff] %vm452_vm2, %v410_v51 }
 0x346   :  { %v413_v52 = vpop.f32.mrf.mxu1 }
 0x347   :  { %456 = vst.msk [vmem:[%s833_s7 + $0x18] sm:$0xff] %vm452_vm2, %v413_v52 }
 0x34e   :  { %v416_v53 = vpop.f32.mrf.mxu1 }
 0x34f   :  { %457 = vst.msk [vmem:[%s833_s7 + $0x20] sm:$0xff] %vm452_vm2, %v416_v53 }
 0x356   :  { %v419_v54 = vpop.f32.mrf.mxu1 }
 0x357   :  { %458 = vst.msk [vmem:[%s833_s7 + $0x28] sm:$0xff] %vm452_vm2, %v419_v54 }
 0x35e   :  { %v422_v55 = vpop.f32.mrf.mxu1 }
 0x35f   :  { %459 = vst.msk [vmem:[%s833_s7 + $0x30] sm:$0xff] %vm452_vm2, %v422_v55 }
 0x36c   :  { %v425_v56 = vpop.f32.mrf.mxu3 }
 0x36d   :  { %460 = vst.msk [vmem:[%s833_s7 + $0x38] sm:$0xff] %vm452_vm2, %v425_v56 }
 0x374   :  { %v428_v57 = vpop.f32.mrf.mxu3 }
 0x375   :  { %461 = vst.msk [vmem:[%s833_s7 + $0x40] sm:$0xff] %vm452_vm2, %v428_v57 }
 0x37c   :  { %v431_v58 = vpop.f32.mrf.mxu3 }
 0x37d   :  { %462 = vst.msk [vmem:[%s833_s7 + $0x48] sm:$0xff] %vm452_vm2, %v431_v58 }
 0x384   :  { %v434_v59 = vpop.f32.mrf.mxu3 }
 0x385   :  { %463 = vst.msk [vmem:[%s833_s7 + $0x50] sm:$0xff] %vm452_vm2, %v434_v59 }
 0x38c   :  { %v437_v60 = vpop.f32.mrf.mxu3 }
 0x38d   :  { %464 = vst.msk [vmem:[%s833_s7 + $0x58] sm:$0xff] %vm452_vm2, %v437_v60 }
 0x394   :  { %v440_v61 = vpop.f32.mrf.mxu3 }
 0x395   :  { %465 = vst.msk [vmem:[%s833_s7 + $0x60] sm:$0xff] %vm452_vm2, %v440_v61 }
 0x39c   :  { %v443_v62 = vpop.f32.mrf.mxu3 }
 0x39d   :  { %466 = vst.msk [vmem:[%s833_s7 + $0x68] sm:$0xff] %vm452_vm2, %v443_v62 }
 0x3a4   :  { %v446_v63 = vpop.f32.mrf.mxu3 }
 0x3a5   :  { %467 = vst.msk [vmem:[%s833_s7 + $0x70] sm:$0xff] %vm452_vm2, %v446_v63 }
 0x3ac   :  { %v449_v0 = vpop.f32.mrf.mxu3 }
 0x3ad   :  { %468 = vst.msk [vmem:[%s833_s7 + $0x78] sm:$0xff] %vm452_vm2, %v449_v0 }

</bundles_post_ra>
